<compile_context>
chip_gen: v7x
topology: tpu7x:2x2x1
jax: 0.10.0
libtpu: 0.0.40
codegen_flags: <defaults>
</compile_context>

<pallas_src>
import functools

import jax
import jax.numpy as jnp
from jax.experimental import pallas as pl
from jax.experimental.pallas import tpu as pltpu

_MXU_DTYPE = jnp.bfloat16     # streamed-operand dtype (f32 accumulation everywhere)
KV_TILE = 1024                # cross-attention KV tile (bf16 -> fits v7x 64 MiB VMEM)
MASK_TN = 2048                # mask-einsum HW tile


def _round_up(x, m):
    return ((x + m - 1) // m) * m


def _default_vmem_limit():
    # Derive per-chip with headroom (v7x: 64 MiB total -> ~48 MiB; v5e/v6e: ~96 MiB).
    try:
        cap = pltpu.get_tpu_info().vmem_capacity_bytes
        return int(cap * 3 // 4)
    except Exception:
        return 48 * 1024 * 1024


_VMEM_LIMIT = _default_vmem_limit()


def _const_spec(shape):
    nd = len(shape)
    return pl.BlockSpec(shape, lambda *_, _nd=nd: (0,) * _nd)


# ----------------------------- generic matmul ------------------------------
# Used for the pixel-decoder 1x1-conv projections and the mask-feature conv.

def _matmul_onek_kernel(x_ref, w_ref, b_ref, o_ref, *, act):
    y = jnp.dot(x_ref[...], w_ref[...], preferred_element_type=jnp.float32) + b_ref[...]
    if act == "relu":
        y = jnp.maximum(y, 0.0)
    o_ref[...] = y.astype(o_ref.dtype)


def _matmul_kernel(x_ref, w_ref, b_ref, o_ref, acc_ref, *, act):
    @pl.when(pl.program_id(2) == 0)
    def _():
        acc_ref[...] = jnp.zeros_like(acc_ref)

    acc_ref[...] += jnp.dot(x_ref[...], w_ref[...], preferred_element_type=jnp.float32)

    @pl.when(pl.program_id(2) == pl.num_programs(2) - 1)
    def _():
        y = acc_ref[...] + b_ref[...]
        if act == "relu":
            y = jnp.maximum(y, 0.0)
        o_ref[...] = y.astype(o_ref.dtype)


def linear_pallas(x2d, w, b, act=None, out_dtype=None, tm=512, tn=512, tk=512):
    """y = act(x2d @ w + b). x2d: (M, K) bf16, w: (K, N) bf16, b: (1, N) f32."""
    M, K = x2d.shape
    N = w.shape[1]
    out_dtype = out_dtype or x2d.dtype
    tm_ = M if M <= tm else tm     # block == full dim when small -> no padding
    tk_ = K if K <= tk else tk
    tn_ = N if N <= tn else tn
    Mp, Kp, Np = _round_up(M, tm_), _round_up(K, tk_), _round_up(N, tn_)

    if (Mp, Kp) != (M, K):
        x2d = jnp.pad(x2d, ((0, Mp - M), (0, Kp - K)))
    if (Kp, Np) != (K, N):
        w = jnp.pad(w, ((0, Kp - K), (0, Np - N)))
    if Np != N:
        b = jnp.pad(b, ((0, 0), (0, Np - N)))

    nk = Kp // tk_
    if nk == 1:
        out = pl.pallas_call(
            functools.partial(_matmul_onek_kernel, act=act),
            out_shape=jax.ShapeDtypeStruct((Mp, Np), out_dtype),
            grid=(Mp // tm_, Np // tn_),
            in_specs=[pl.BlockSpec((tm_, Kp), lambda i, j: (i, 0)),
                      pl.BlockSpec((Kp, tn_), lambda i, j: (0, j)),
                      pl.BlockSpec((1, tn_), lambda i, j: (0, j))],
            out_specs=pl.BlockSpec((tm_, tn_), lambda i, j: (i, j)),
            compiler_params=pltpu.CompilerParams(
                dimension_semantics=("parallel", "parallel"),
                vmem_limit_bytes=_VMEM_LIMIT),
        )(x2d, w, b)
    else:
        out = pl.pallas_call(
            functools.partial(_matmul_kernel, act=act),
            out_shape=jax.ShapeDtypeStruct((Mp, Np), out_dtype),
            grid=(Mp // tm_, Np // tn_, nk),
            in_specs=[pl.BlockSpec((tm_, tk_), lambda i, j, k: (i, k)),
                      pl.BlockSpec((tk_, tn_), lambda i, j, k: (k, j)),
                      pl.BlockSpec((1, tn_), lambda i, j, k: (0, j))],
            out_specs=pl.BlockSpec((tm_, tn_), lambda i, j, k: (i, j)),
            scratch_shapes=[pltpu.VMEM((tm_, tn_), jnp.float32)],
            compiler_params=pltpu.CompilerParams(
                dimension_semantics=("parallel", "parallel", "arbitrary"),
                vmem_limit_bytes=_VMEM_LIMIT),
        )(x2d, w, b)

    if (Mp, Np) != (M, N):
        out = out[:M, :N]
    return out


# ------------------------ fused cross-attention block ----------------------
# One pallas_call: q-proj (kv==0) -> per-tile kv-proj -> flash online softmax
# -> out-proj + residual + LayerNorm (last kv tile).  Heads live in the lane
# axis; accumulator updates are a single lane-dense (Lq, D) store per tile.

def _cross_attn_kernel(x_ref, qpos_ref, src_ref, wq_ref, bq_ref, wkv_ref, bkv_ref,
                       wo_ref, bo_ref, g_ref, be_ref, o_ref,
                       q_scr, m_scr, l_scr, acc_scr,
                       *, nheads, scale, kv_len, tk, needs_mask):
    kv = pl.program_id(1)
    Lq, D = acc_scr.shape
    hd = D // nheads

    @pl.when(kv == 0)
    def _():
        qin = (x_ref[0] + qpos_ref[...]).astype(_MXU_DTYPE)
        q = jnp.dot(qin, wq_ref[...], preferred_element_type=jnp.float32) + bq_ref[...]
        q_scr[...] = (q * scale).astype(_MXU_DTYPE)     # fold 1/sqrt(hd) into q
        m_scr[...] = jnp.full(m_scr.shape, -1e30, jnp.float32)
        l_scr[...] = jnp.zeros(l_scr.shape, jnp.float32)
        acc_scr[...] = jnp.zeros(acc_scr.shape, jnp.float32)

    # fused K|V projection of this KV tile
    kvp = jnp.dot(src_ref[0], wkv_ref[...], preferred_element_type=jnp.float32) + bkv_ref[...]
    kvp = kvp.astype(_MXU_DTYPE)
    k = kvp[:, :D]
    v = kvp[:, D:]

    if needs_mask:
        col = jax.lax.broadcasted_iota(jnp.int32, (1, tk), 1) + kv * tk
        valid = col < kv_len

    q = q_scr[...]
    alphas, pvs = [], []
    for h in range(nheads):
        lo = h * hd
        s = jax.lax.dot_general(q[:, lo:lo + hd], k[:, lo:lo + hd],
                                (((1,), (1,)), ((), ())),
                                preferred_element_type=jnp.float32)   # (Lq, tk)
        if needs_mask:
            s = jnp.where(valid, s, -1e30)
        m_prev = m_scr[h]
        m_new = jnp.maximum(m_prev, jnp.max(s, axis=-1, keepdims=True))
        alpha = jnp.exp(m_prev - m_new)                               # f32 softmax math
        p = jnp.exp(s - m_new)
        l_scr[h] = alpha * l_scr[h] + jnp.sum(p, axis=-1, keepdims=True)
        m_scr[h] = m_new
        pvs.append(jax.lax.dot_general(p.astype(_MXU_DTYPE), v[:, lo:lo + hd],
                                       (((1,), (0,)), ((), ())),
                                       preferred_element_type=jnp.float32))
        alphas.append(jnp.broadcast_to(alpha, (Lq, hd)))
    # single lane-dense accumulator update per KV tile
    acc_scr[...] = jnp.concatenate(alphas, -1) * acc_scr[...] + jnp.concatenate(pvs, -1)

    @pl.when(kv == pl.num_programs(1) - 1)
    def _():
        invs = [jnp.broadcast_to(pl.reciprocal(l_scr[h], approx=True), (Lq, hd))
                for h in range(nheads)]
        attn = (acc_scr[...] * jnp.concatenate(invs, -1)).astype(_MXU_DTYPE)
        o = jnp.dot(attn, wo_ref[...], preferred_element_type=jnp.float32) + bo_ref[...]
        y = x_ref[0].astype(jnp.float32) + o                           # residual
        mu = jnp.mean(y, axis=-1, keepdims=True)
        var = jnp.mean((y - mu) ** 2, axis=-1, keepdims=True)
        yn = (y - mu) * jax.lax.rsqrt(var + 1e-5) * g_ref[...] + be_ref[...]
        o_ref[...] = yn[None].astype(o_ref.dtype)


def cross_attn_block(x, qpos, src, kv_len, p, g, be, nheads):
    """x: (B, Lq, D), qpos: (Lq, D), src: (B, Lk, D) (Lk pre-padded to KV_TILE)."""
    B, Lq, D = x.shape
    Lk = src.shape[1]
    tk = Lk if Lk <= KV_TILE else KV_TILE
    nkv = Lk // tk
    scale = 1.0 / float(D // nheads) ** 0.5
    needs_mask = kv_len < Lk
    kernel = functools.partial(_cross_attn_kernel, nheads=nheads, scale=scale,
                               kv_len=kv_len, tk=tk, needs_mask=needs_mask)
    return pl.pallas_call(
        kernel,
        out_shape=jax.ShapeDtypeStruct((B, Lq, D), x.dtype),
        grid=(B, nkv),
        in_specs=[pl.BlockSpec((1, Lq, D), lambda b, j: (b, 0, 0)),
                  pl.BlockSpec((Lq, D), lambda b, j: (0, 0)),
                  pl.BlockSpec((1, tk, D), lambda b, j: (b, j, 0)),
                  _const_spec(p['wq'].shape), _const_spec(p['bq'].shape),
                  _const_spec(p['wkv'].shape), _const_spec(p['bkv'].shape),
                  _const_spec(p['wo'].shape), _const_spec(p['bo'].shape),
                  _const_spec(g.shape), _const_spec(be.shape)],
        out_specs=pl.BlockSpec((1, Lq, D), lambda b, j: (b, 0, 0)),
        scratch_shapes=[pltpu.VMEM((Lq, D), _MXU_DTYPE),
                        pltpu.VMEM((nheads, Lq, 1), jnp.float32),
                        pltpu.VMEM((nheads, Lq, 1), jnp.float32),
                        pltpu.VMEM((Lq, D), jnp.float32)],
        compiler_params=pltpu.CompilerParams(
            dimension_semantics=("parallel", "arbitrary"),
            vmem_limit_bytes=_VMEM_LIMIT),
    )(x, qpos, src, p['wq'], p['bq'], p['wkv'], p['bkv'], p['wo'], p['bo'], g, be)


# ------------------------- fused self-attention block ----------------------

def _self_attn_kernel(x_ref, qpos_ref, wqk_ref, bqk_ref, wv_ref, bv_ref,
                      wo_ref, bo_ref, g_ref, be_ref, o_ref, *, nheads, scale):
    x = x_ref[0]                                  # (Lq, D) bf16
    Lq, D = x.shape
    hd = D // nheads
    qp = (x + qpos_ref[...]).astype(_MXU_DTYPE)
    qk = jnp.dot(qp, wqk_ref[...], preferred_element_type=jnp.float32) + bqk_ref[...]
    q = (qk[:, :D] * scale).astype(_MXU_DTYPE)
    k = qk[:, D:].astype(_MXU_DTYPE)
    v = (jnp.dot(x, wv_ref[...], preferred_element_type=jnp.float32)
         + bv_ref[...]).astype(_MXU_DTYPE)
    outs = []
    for h in range(nheads):
        lo = h * hd
        s = jax.lax.dot_general(q[:, lo:lo + hd], k[:, lo:lo + hd],
                                (((1,), (1,)), ((), ())),
                                preferred_element_type=jnp.float32)     # (Lq, Lq)
        s = s - jnp.max(s, axis=-1, keepdims=True)
        p = jnp.exp(s)
        p = p * pl.reciprocal(jnp.sum(p, axis=-1, keepdims=True), approx=True)
        outs.append(jax.lax.dot_general(p.astype(_MXU_DTYPE), v[:, lo:lo + hd],
                                        (((1,), (0,)), ((), ())),
                                        preferred_element_type=jnp.float32))
    attn = jnp.concatenate(outs, -1).astype(_MXU_DTYPE)
    o = jnp.dot(attn, wo_ref[...], preferred_element_type=jnp.float32) + bo_ref[...]
    y = x.astype(jnp.float32) + o
    mu = jnp.mean(y, axis=-1, keepdims=True)
    var = jnp.mean((y - mu) ** 2, axis=-1, keepdims=True)
    yn = (y - mu) * jax.lax.rsqrt(var + 1e-5) * g_ref[...] + be_ref[...]
    o_ref[...] = yn[None].astype(o_ref.dtype)


def self_attn_block(x, qpos, p, g, be, nheads):
    B, Lq, D = x.shape
    scale = 1.0 / float(D // nheads) ** 0.5
    kernel = functools.partial(_self_attn_kernel, nheads=nheads, scale=scale)
    return pl.pallas_call(
        kernel,
        out_shape=jax.ShapeDtypeStruct((B, Lq, D), x.dtype),
        grid=(B,),
        in_specs=[pl.BlockSpec((1, Lq, D), lambda b: (b, 0, 0)),
                  pl.BlockSpec((Lq, D), lambda b: (0, 0)),
                  _const_spec(p['wqk'].shape), _const_spec(p['bqk'].shape),
                  _const_spec(p['wv'].shape), _const_spec(p['bv'].shape),
                  _const_spec(p['wo'].shape), _const_spec(p['bo'].shape),
                  _const_spec(g.shape), _const_spec(be.shape)],
        out_specs=pl.BlockSpec((1, Lq, D), lambda b: (b, 0, 0)),
        compiler_params=pltpu.CompilerParams(
            dimension_semantics=("parallel",),
            vmem_limit_bytes=_VMEM_LIMIT),
    )(x, qpos, p['wqk'], p['bqk'], p['wv'], p['bv'], p['wo'], p['bo'], g, be)


# ------------------------------ fused FFN block -----------------------------

def _ffn_kernel(x_ref, w1_ref, b1_ref, w2_ref, b2_ref, g_ref, be_ref, o_ref):
    x = x_ref[...]
    h = jnp.maximum(jnp.dot(x, w1_ref[...], preferred_element_type=jnp.float32)
                    + b1_ref[...], 0.0)
    o = jnp.dot(h.astype(_MXU_DTYPE), w2_ref[...],
                preferred_element_type=jnp.float32) + b2_ref[...]
    y = x.astype(jnp.float32) + o
    mu = jnp.mean(y, axis=-1, keepdims=True)
    var = jnp.mean((y - mu) ** 2, axis=-1, keepdims=True)
    o_ref[...] = ((y - mu) * jax.lax.rsqrt(var + 1e-5) * g_ref[...]
                  + be_ref[...]).astype(o_ref.dtype)


def ffn_block(x, lp, g, be):
    B, Q, D = x.shape
    M = B * Q
    x2 = x.reshape(M, D)
    tm = M if M <= 512 else 512
    Mp = _round_up(M, tm)
    if Mp != M:
        x2 = jnp.pad(x2, ((0, Mp - M), (0, 0)))
    out = pl.pallas_call(
        _ffn_kernel,
        out_shape=jax.ShapeDtypeStruct((Mp, D), x.dtype),
        grid=(Mp // tm,),
        in_specs=[pl.BlockSpec((tm, D), lambda i: (i, 0)),
                  _const_spec(lp['ffn_w1'].shape), _const_spec(lp['ffn_b1'].shape),
                  _const_spec(lp['ffn_w2'].shape), _const_spec(lp['ffn_b2'].shape),
                  _const_spec(g.shape), _const_spec(be.shape)],
        out_specs=pl.BlockSpec((tm, D), lambda i: (i, 0)),
        compiler_params=pltpu.CompilerParams(
            dimension_semantics=("parallel",),
            vmem_limit_bytes=_VMEM_LIMIT),
    )(x2, lp['ffn_w1'], lp['ffn_b1'], lp['ffn_w2'], lp['ffn_b2'], g, be)
    if Mp != M:
        out = out[:M]
    return out.reshape(B, Q, D)


# -------------------- fused prediction heads (LN + class + MLP) -------------

def _predict_heads_kernel(x_ref, g_ref, b_ref, cw_ref, cb_ref,
                          w0_ref, b0_ref, w1_ref, b1_ref, w2_ref, b2_ref,
                          logits_ref, membed_ref):
    x = x_ref[...].astype(jnp.float32)
    mu = jnp.mean(x, axis=-1, keepdims=True)
    var = jnp.mean((x - mu) ** 2, axis=-1, keepdims=True)
    xn = ((x - mu) * jax.lax.rsqrt(var + 1e-5) * g_ref[...] + b_ref[...]).astype(_MXU_DTYPE)
    logits = jnp.dot(xn, cw_ref[...], preferred_element_type=jnp.float32) + cb_ref[...]
    logits_ref[...] = logits.astype(logits_ref.dtype)
    h = jnp.maximum(jnp.dot(xn, w0_ref[...], preferred_element_type=jnp.float32)
                    + b0_ref[...], 0.0)
    h = jnp.maximum(jnp.dot(h.astype(_MXU_DTYPE), w1_ref[...],
                            preferred_element_type=jnp.float32) + b1_ref[...], 0.0)
    m = jnp.dot(h.astype(_MXU_DTYPE), w2_ref[...],
                preferred_element_type=jnp.float32) + b2_ref[...]
    membed_ref[...] = m.astype(membed_ref.dtype)


def predict_heads_pallas(x, params, cfg):
    B, Q, D = x.shape
    nc1 = cfg['num_classes'] + 1
    md = cfg['mask_dim']
    M = B * Q
    x2 = x.reshape(M, D)
    tm = M if M <= 512 else 512
    Mp = _round_up(M, tm)
    if Mp != M:
        x2 = jnp.pad(x2, ((0, Mp - M), (0, 0)))
    args = (x2, params['decoder_norm_g'], params['decoder_norm_b'],
            params['class_w'], params['class_b'],
            params['mask_mlp_w0'], params['mask_mlp_b0'],
            params['mask_mlp_w1'], params['mask_mlp_b1'],
            params['mask_mlp_w2'], params['mask_mlp_b2'])
    logits, membed = pl.pallas_call(
        _predict_heads_kernel,
        out_shape=(jax.ShapeDtypeStruct((Mp, nc1), jnp.float32),
                   jax.ShapeDtypeStruct((Mp, md), _MXU_DTYPE)),
        grid=(Mp // tm,),
        in_specs=[pl.BlockSpec((tm, D), lambda i: (i, 0))]
                 + [_const_spec(a.shape) for a in args[1:]],
        out_specs=(pl.BlockSpec((tm, nc1), lambda i: (i, 0)),
                   pl.BlockSpec((tm, md), lambda i: (i, 0))),
        compiler_params=pltpu.CompilerParams(
            dimension_semantics=("parallel",),
            vmem_limit_bytes=_VMEM_LIMIT),
    )(*args)
    if Mp != M:
        logits, membed = logits[:M], membed[:M]
    return logits.reshape(B, Q, nc1), membed.reshape(B, Q, md)


# ------------------------------ mask einsum ---------------------------------
# einsum('bqc,bnc->bqn') with channel-last mask features, tiled over HW.

def _mask_kernel(me_ref, mf_ref, o_ref):
    o_ref[...] = jax.lax.dot_general(
        me_ref[0], mf_ref[0], (((1,), (1,)), ((), ())),
        preferred_element_type=jnp.float32)[None].astype(o_ref.dtype)


def mask_einsum_pallas(mask_embed, mf_flat, hw):
    B, Q, C = mask_embed.shape
    HWp = mf_flat.shape[1]
    tn = HWp if HWp <= MASK_TN else MASK_TN
    out = pl.pallas_call(
        _mask_kernel,
        out_shape=jax.ShapeDtypeStruct((B, Q, HWp), jnp.float32),
        grid=(B, HWp // tn),
        in_specs=[pl.BlockSpec((1, Q, C), lambda b, j: (b, 0, 0)),
                  pl.BlockSpec((1, tn, C), lambda b, j: (b, j, 0))],
        out_specs=pl.BlockSpec((1, Q, tn), lambda b, j: (b, 0, j)),
        compiler_params=pltpu.CompilerParams(
            dimension_semantics=("parallel", "parallel"),
            vmem_limit_bytes=_VMEM_LIMIT),
    )(mask_embed, mf_flat)
    if HWp != hw:
        out = out[:, :, :hw]
    return out


# ----------------------------- Parameter init -------------------------------

def _dense(key, fan_in, fan_out):
    kw, kb = jax.random.split(key)
    w = (jax.random.normal(kw, (fan_in, fan_out), jnp.float32) * 0.02).astype(_MXU_DTYPE)
    b = jax.random.normal(kb, (1, fan_out), jnp.float32) * 0.02     # f32 biases
    return w, b


def init_params(key, cfg):
    D = cfg['hidden_dim']
    params = {}
    keys = iter(jax.random.split(key, 256))

    # pixel decoder: 1x1 lateral convs + mask feature conv (as matmuls)
    for name, cin in cfg['in_channels'].items():
        w, b = _dense(next(keys), cin, D)
        params[f'proj_{name}_w'], params[f'proj_{name}_b'] = w, b
    params['mask_feat_w'], params['mask_feat_b'] = _dense(next(keys), D, cfg['mask_dim'])

    def _emb(k, shape):
        return (jax.random.normal(k, shape, jnp.float32) * 0.02).astype(_MXU_DTYPE)

    params['query_feat'] = _emb(next(keys), (cfg['num_queries'], D))
    params['query_embed'] = _emb(next(keys), (cfg['num_queries'], D))
    params['level_embed'] = _emb(next(keys), (cfg['num_feature_levels'], D))

    layers = []
    for _ in range(cfg['dec_layers']):
        lp = {}
        cross = {}
        cross['wq'], cross['bq'] = _dense(next(keys), D, D)
        cross['wkv'], cross['bkv'] = _dense(next(keys), D, 2 * D)     # fused K|V proj
        cross['wo'], cross['bo'] = _dense(next(keys), D, D)
        lp['cross'] = cross
        selfa = {}
        selfa['wqk'], selfa['bqk'] = _dense(next(keys), D, 2 * D)     # fused Q|K proj
        selfa['wv'], selfa['bv'] = _dense(next(keys), D, D)
        selfa['wo'], selfa['bo'] = _dense(next(keys), D, D)
        lp['self'] = selfa
        lp['ffn_w1'], lp['ffn_b1'] = _dense(next(keys), D, cfg['dim_feedforward'])
        lp['ffn_w2'], lp['ffn_b2'] = _dense(next(keys), cfg['dim_feedforward'], D)
        for nm in ('norm_ca', 'norm_sa', 'norm_ffn'):
            lp[f'{nm}_g'] = jnp.ones((1, D), jnp.float32)
            lp[f'{nm}_b'] = jnp.zeros((1, D), jnp.float32)
        layers.append(lp)
    params['layers'] = layers

    params['decoder_norm_g'] = jnp.ones((1, D), jnp.float32)
    params['decoder_norm_b'] = jnp.zeros((1, D), jnp.float32)
    params['class_w'], params['class_b'] = _dense(next(keys), D, cfg['num_classes'] + 1)
    params['mask_mlp_w0'], params['mask_mlp_b0'] = _dense(next(keys), D, D)
    params['mask_mlp_w1'], params['mask_mlp_b1'] = _dense(next(keys), D, D)
    params['mask_mlp_w2'], params['mask_mlp_b2'] = _dense(next(keys), D, cfg['mask_dim'])
    return params


# ------------------------------- Forward pass --------------------------------

def pixel_decoder_forward(features, params, cfg):
    D = cfg['hidden_dim']
    projected = {}
    for name in ('res2', 'res3', 'res4', 'res5'):
        x = features[name]                                   # (B, C, H, W) NCHW f32
        B, C, H, W = x.shape
        # single layout conversion + bf16 cast at model entry; channel-last after this
        xl = jnp.transpose(x, (0, 2, 3, 1)).astype(_MXU_DTYPE)
        y = linear_pallas(xl.reshape(B * H * W, C),
                          params[f'proj_{name}_w'], params[f'proj_{name}_b'])
        projected[name] = y.reshape(B, H, W, D)              # NHWC, bf16

    # TODO(synk): MSDeformAttn transformer encoder over the multi-scale levels is
    # not reproducible from the given source; projected features are used directly.

    B, H2, W2, _ = projected['res2'].shape
    mf = linear_pallas(projected['res2'].reshape(B * H2 * W2, D),
                       params['mask_feat_w'], params['mask_feat_b'])
    mask_features = mf.reshape(B, H2, W2, cfg['mask_dim'])   # NHWC (kept channel-last)
    transformer_encoder_features = projected['res5']
    multi_scale_features = [projected[n] for n in ('res5', 'res4', 'res3')
                            ][:cfg['num_feature_levels']]    # NHWC, coarse -> fine
    return mask_features, transformer_encoder_features, multi_scale_features


def predictor_forward(multi_scale_features, mask_features, params, cfg):
    D = cfg['hidden_dim']
    nheads = cfg['nheads']
    Bm, Hm, Wm, Cm = mask_features.shape
    B = Bm
    Q = cfg['num_queries']

    # flatten each NHWC scale to (B, HW, D) (pure reshape, no transpose) + level embed;
    # pad the KV length ONCE per level (not per decoder layer).
    srcs, src_lens = [], []
    for lvl, f in enumerate(multi_scale_features):
        Bf, Hf, Wf, _ = f.shape
        hw = Hf * Wf
        s = f.reshape(Bf, hw, D) + params['level_embed'][lvl][None, None, :]
        if hw > KV_TILE and hw % KV_TILE != 0:
            s = jnp.pad(s, ((0, 0), (0, _round_up(hw, KV_TILE) - hw), (0, 0)))
        srcs.append(s)
        src_lens.append(hw)

    query_pos2d = params['query_embed']                              # (Q, D) bf16
    output = jnp.broadcast_to(params['query_feat'][None], (B, Q, D))  # bf16

    # mask features flattened + padded once per forward (re-read every aux output)
    HW = Hm * Wm
    mf_flat = mask_features.reshape(Bm, HW, Cm)                      # (B, HW, C) bf16
    if HW > MASK_TN and HW % MASK_TN != 0:
        mf_flat = jnp.pad(mf_flat, ((0, 0), (0, _round_up(HW, MASK_TN) - HW), (0, 0)))

    def predict_heads(out):
        logits, membed = predict_heads_pallas(out, params, cfg)
        masks = mask_einsum_pallas(membed, mf_flat, HW).reshape(Bm, Q, Hm, Wm)
        return logits, masks

    all_logits, all_masks = [], []
    l0, m0 = predict_heads(output)
    all_logits.append(l0)
    all_masks.append(m0)

    num_levels = len(srcs)
    for i in range(cfg['dec_layers']):
        lvl = i % num_levels
        lp = params['layers'][i]

        # TODO(synk): per-layer attention masking from intermediate mask predictions
        # and the sinusoidal positional embedding added to cross-attention keys are
        # omitted (no reference implementation provided).

        output = cross_attn_block(output, query_pos2d, srcs[lvl], src_lens[lvl],
                                  lp['cross'], lp['norm_ca_g'], lp['norm_ca_b'], nheads)
        output = self_attn_block(output, query_pos2d, lp['self'],
                                 lp['norm_sa_g'], lp['norm_sa_b'], nheads)
        output = ffn_block(output, lp, lp['norm_ffn_g'], lp['norm_ffn_b'])

        li, mi = predict_heads(output)
        all_logits.append(li)
        all_masks.append(mi)

    predictions = {
        'pred_logits': all_logits[-1],
        'pred_masks': all_masks[-1],
        'aux_outputs': [{'pred_logits': l, 'pred_masks': m}
                        for l, m in zip(all_logits[:-1], all_masks[:-1])],
    }
    query_pos = jnp.broadcast_to(params['query_embed'][None], (B, Q, D)).astype(jnp.float32)
    query_src = output.astype(jnp.float32)
    return predictions, query_pos, query_src


def maskformer_head_forward(features, params, cfg, mask=None):
    mask_features, transformer_encoder_features, multi_scale_features = \
        pixel_decoder_forward(features, params, cfg)
    predictions, query_pos, query_src = \
        predictor_forward(multi_scale_features, mask_features, params, cfg)
    return predictions, query_pos, query_src, multi_scale_features


# ---------------------------------- Main -------------------------------------

if __name__ == "__main__":
    # cfg equivalent: {'use_pixel_decoder': False, 'use_ori_query': True}
    cfg = {
        'in_channels': {'res2': 4, 'res3': 8, 'res4': 16, 'res5': 32},
        'hidden_dim': 32,        # scaled-down conv_dim / hidden_dim (256 in the module)
        'mask_dim': 32,          # scaled-down mask_dim (256)
        'num_queries': 8,        # scaled-down (100)
        'num_classes': 10,       # scaled-down (150)
        'nheads': 4,             # scaled-down (8)
        'dim_feedforward': 64,   # scaled-down (2048)
        'dec_layers': 3,         # scaled-down (9)
        'num_feature_levels': 3, # use_pixel_decoder=False -> 3 levels
    }

    key = jax.random.PRNGKey(0)
    k_feat, k_param = jax.random.split(key)
    kf = jax.random.split(k_feat, 4)
    features = {
        'res2': jax.random.normal(kf[0], (2, 4, 16, 16), jnp.float32),
        'res3': jax.random.normal(kf[1], (2, 8, 8, 8), jnp.float32),
        'res4': jax.random.normal(kf[2], (2, 16, 4, 4), jnp.float32),
        'res5': jax.random.normal(kf[3], (2, 32, 2, 2), jnp.float32),
    }
    params = init_params(k_param, cfg)

    out = maskformer_head_forward(features, params, cfg)
    out = jax.block_until_ready(out)

    predictions, query_pos, query_src, multi_scale_features = out
    assert predictions['pred_logits'].shape == (2, cfg['num_queries'], cfg['num_classes'] + 1)
    assert predictions['pred_masks'].shape == (2, cfg['num_queries'], 16, 16)
    assert query_pos.shape == (2, cfg['num_queries'], cfg['hidden_dim'])
    assert query_src.shape == (2, cfg['num_queries'], cfg['hidden_dim'])
    assert len(multi_scale_features) == 3
    print("KERNEL_OK")
</pallas_src>

<mosaic_0001>
module attributes {stable_mosaic.version = 11 : i64} {
  func.func @_matmul_onek_kernel(%arg0: i32, %arg1: i32, %arg2: memref<512x4xbf16, #tpu.memory_space<vmem>>, %arg3: memref<4x32xbf16, #tpu.memory_space<vmem>>, %arg4: memref<1x32xf32, #tpu.memory_space<vmem>>, %arg5: memref<512x32xbf16, #tpu.memory_space<vmem>>) attributes {dimension_semantics = [#tpu.dimension_semantics<parallel>, #tpu.dimension_semantics<parallel>], iteration_bounds = array<i64: 1, 1>, scalar_prefetch = 0 : i64, scratch_operands = 0 : i64, tpu.core_type = #tpu.core_type<tc>, window_params = [{transform_indices = @transform_0, window_bounds = array<i64: 512, 4>}, {transform_indices = @transform_1, window_bounds = array<i64: 4, 32>}, {transform_indices = @transform_2, window_bounds = array<i64: 1, 32>}, {transform_indices = @transform_3, window_bounds = array<i64: 512, 32>}]} {
    %c0 = arith.constant 0 : index
    %c0_0 = arith.constant 0 : index
    %0 = vector.load %arg2[%c0, %c0_0] : memref<512x4xbf16, #tpu.memory_space<vmem>>, vector<512x4xbf16>
    %c0_1 = arith.constant 0 : index
    %c0_2 = arith.constant 0 : index
    %1 = vector.load %arg3[%c0_1, %c0_2] : memref<4x32xbf16, #tpu.memory_space<vmem>>, vector<4x32xbf16>
    %cst = arith.constant dense<0.000000e+00> : vector<512x32xf32>
    %2 = tpu.matmul %0, %1, %cst {dimension_numbers = #tpu.dot_dimension_numbers<[1], [0], [0], [1], [0, 0, 1, 1], [], []>} : vector<512x4xbf16>, vector<4x32xbf16>, vector<512x32xf32> -> vector<512x32xf32>
    %c0_3 = arith.constant 0 : index
    %c0_4 = arith.constant 0 : index
    %3 = vector.load %arg4[%c0_3, %c0_4] : memref<1x32xf32, #tpu.memory_space<vmem>>, vector<1x32xf32>
    %4 = vector.broadcast %3 : vector<1x32xf32> to vector<512x32xf32>
    %5 = arith.addf %2, %4 : vector<512x32xf32>
    %6 = arith.truncf %5 : vector<512x32xf32> to vector<512x32xbf16>
    %c0_5 = arith.constant 0 : index
    %c0_6 = arith.constant 0 : index
    %7 = vector.load %arg5[%c0_5, %c0_6] : memref<512x32xbf16, #tpu.memory_space<vmem>>, vector<512x32xbf16>
    tpu.vector_store %arg5[%c0_5, %c0_6], %6 {strides = array<i32>} : memref<512x32xbf16, #tpu.memory_space<vmem>>, vector<512x32xbf16>,
    return
  }
  func.func @transform_0(%arg0: i32, %arg1: i32) -> (i32, i32) {
    %c0_i32 = arith.constant 0 : i32
    %c0_i32_0 = arith.constant 0 : i32
    return %arg0, %c0_i32 : i32, i32
  }
  func.func @transform_1(%arg0: i32, %arg1: i32) -> (i32, i32) {
    %c0_i32 = arith.constant 0 : i32
    %c0_i32_0 = arith.constant 0 : i32
    return %c0_i32, %arg1 : i32, i32
  }
  func.func @transform_2(%arg0: i32, %arg1: i32) -> (i32, i32) {
    %c0_i32 = arith.constant 0 : i32
    %c0_i32_0 = arith.constant 0 : i32
    return %c0_i32, %arg1 : i32, i32
  }
  func.func @transform_3(%arg0: i32, %arg1: i32) -> (i32, i32) {
    %c0_i32 = arith.constant 0 : i32
    return %arg0, %arg1 : i32, i32
  }
}

</mosaic_0001>

<bundles_post_ra>
// kernel: tpu_custom_call.1
= control target key start
LH: loop header
LB: loop body
LE: loop exit
PB: predicated region body
PF: predicated region fallthrough
CT: control target
= control target key end

     0   :  { %vm344_vm0 = vcmask 1041408   ;;  %vm247_vm1 = vcmask 31744   ;;  %vm893_vm2 = vcmask 257024   ;;  %s1766_s1 = inlined_call_operand.vmem [shape: bf16[4,32], index: 1, kind: input, shape index: {}]   ;;  %s1767_s0 = inlined_call_operand.vmem [shape: bf16[512,4], index: 0, kind: input, shape index: {}]   ;;  %s1768_s2 = inlined_call_operand.vmem [shape: f32[1,32], index: 2, kind: input, shape index: {}]   ;;  %s1769_s3 = inlined_call_operand.vmem [shape: bf16[512,32], index: 3, kind: output, shape index: {}]  }
   0x1   :  { %v79_v0 = vld [vmem:[%s1766_s1] sm:$0x3]  ;;  %v1260_v4 = vld [vmem:[%s1767_s0 + $0x8] sm:$0xff]   ;;  %v1262_v6 = vld [vmem:[%s1767_s0 + $0x10] sm:$0xff]  }
   0x2   :  { %1256 = vmatprep.subr.msk.bf16.mxu0 %vm344_vm0, %v79_v0  ;;  %1257 = vmatprep.subr.msk.bf16.mxu1 %vm344_vm0, %v79_v0  ;;  %v346_v1 = vsel %vm344_vm0, %v79_v0, 0  ;;  %v1258_v2 = vld [vmem:[%s1767_s0] sm:$0xff]   ;;  %v1261_v5 = vld [vmem:[%s1767_s0 + $0x88] sm:$0xff]   ;;  %v1263_v7 = vld [vmem:[%s1767_s0 + $0x90] sm:$0xff]  }
   0x3   :  { %1189 = vmatpush3.bf16.msra.mxu0 %v346_v1  ;;  %1255 = vmatpush3.bf16.msra.mxu1 %v346_v1  ;;  %v1259_v3 = vld [vmem:[%s1767_s0 + $0x80] sm:$0xff]   ;;  %v1264_v8 = vld [vmem:[%s1767_s0 + $0x18] sm:$0xff]   ;;  %v1268_v12 = vld [vmem:[%s1767_s0 + $0x28] sm:$0xff]  }
   0x4   :  { %1190 = vmatprep.mubr.msk.bf16.mxu0 %vm247_vm1, %v1258_v2  ;;  %1222 = vmatprep.mubr.msk.bf16.mxu1 %vm247_vm1, %v1259_v3  ;;  %v1265_v9 = vld [vmem:[%s1767_s0 + $0x98] sm:$0xff]   ;;  %v1266_v10 = vld [vmem:[%s1767_s0 + $0x20] sm:$0xff]   ;;  %v1269_v13 = vld [vmem:[%s1767_s0 + $0xa8] sm:$0xff]  }
   0x5   :  { %v1267_v11 = vld [vmem:[%s1767_s0 + $0xa0] sm:$0xff]   ;;  %v1270_v14 = vld [vmem:[%s1767_s0 + $0x30] sm:$0xff]   ;;  %v1272_v16 = vld [vmem:[%s1767_s0 + $0x38] sm:$0xff]  }
   0x6   :  { %1191 = vmatmul.mubr.msk.bf16.vlgmr.msra.gmra.mrb[0].mxu0 %vm247_vm1, %v1260_v4  ;;  %1223 = vmatmul.mubr.msk.bf16.vlgmr.msra.gmra.mrb[0].mxu1 %vm247_vm1, %v1261_v5  ;;  %v1271_v15 = vld [vmem:[%s1767_s0 + $0xb0] sm:$0xff]   ;;  %v1273_v17 = vld [vmem:[%s1767_s0 + $0xb8] sm:$0xff]   ;;  %v1274_v18 = vld [vmem:[%s1767_s0 + $0x40] sm:$0xff]  }
   0x7   :  { %1194 = vmatprep.mubr.msk.bf16.mxu0 %vm247_vm1, %v1262_v6  ;;  %1226 = vmatprep.mubr.msk.bf16.mxu1 %vm247_vm1, %v1263_v7  ;;  %v1275_v19 = vld [vmem:[%s1767_s0 + $0xc0] sm:$0xff]   ;;  %v1276_v20 = vld [vmem:[%s1767_s0 + $0x48] sm:$0xff]   ;;  %v1278_v22 = vld [vmem:[%s1767_s0 + $0x50] sm:$0xff]  }
   0x8   :  { %v1277_v21 = vld [vmem:[%s1767_s0 + $0xc8] sm:$0xff]   ;;  %v1279_v23 = vld [vmem:[%s1767_s0 + $0xd0] sm:$0xff]   ;;  %v1280_v24 = vld [vmem:[%s1767_s0 + $0x58] sm:$0xff]  }
   0x9   :  { %v1281_v25 = vld [vmem:[%s1767_s0 + $0xd8] sm:$0xff]   ;;  %v1282_v26 = vld [vmem:[%s1767_s0 + $0x60] sm:$0xff]   ;;  %v1284_v28 = vld [vmem:[%s1767_s0 + $0x68] sm:$0xff]  }
   0xa   :  { %v1283_v27 = vld [vmem:[%s1767_s0 + $0xe0] sm:$0xff]   ;;  %v1285_v29 = vld [vmem:[%s1767_s0 + $0xe8] sm:$0xff]   ;;  %v1286_v30 = vld [vmem:[%s1767_s0 + $0x70] sm:$0xff]  }
   0xb   :  { %v1287_v31 = vld [vmem:[%s1767_s0 + $0xf0] sm:$0xff]   ;;  %v1288_v32 = vld [vmem:[%s1767_s0 + $0x78] sm:$0xff]   ;;  %v1444_v34 = vld [vmem:[%s1768_s2] ss:$0 sm:$0xff] }
   0xc   :  { %v1289_v33 = vld [vmem:[%s1767_s0 + $0xf8] sm:$0xff]  }
   0xe   :  { %1195 = vmatmul.mubr.msk.bf16.gmra.mrb[4].mxu0 %vm247_vm1, %v1264_v8  ;;  %1227 = vmatmul.mubr.msk.bf16.gmra.mrb[4].mxu1 %vm247_vm1, %v1265_v9 }
   0xf   :  { %1198 = vmatprep.mubr.msk.bf16.mxu0 %vm247_vm1, %v1266_v10  ;;  %1230 = vmatprep.mubr.msk.bf16.mxu1 %vm247_vm1, %v1267_v11 }
  0x16   :  { %1199 = vmatmul.mubr.msk.bf16.gmra.mrb[8].mxu0 %vm247_vm1, %v1268_v12  ;;  %1231 = vmatmul.mubr.msk.bf16.gmra.mrb[8].mxu1 %vm247_vm1, %v1269_v13 }
  0x17   :  { %1202 = vmatprep.mubr.msk.bf16.mxu0 %vm247_vm1, %v1270_v14  ;;  %1234 = vmatprep.mubr.msk.bf16.mxu1 %vm247_vm1, %v1271_v15 }
  0x1e   :  { %1203 = vmatmul.mubr.msk.bf16.gmra.mrb[12].mxu0 %vm247_vm1, %v1272_v16  ;;  %1235 = vmatmul.mubr.msk.bf16.gmra.mrb[12].mxu1 %vm247_vm1, %v1273_v17 }
  0x1f   :  { %1206 = vmatprep.mubr.msk.bf16.mxu0 %vm247_vm1, %v1274_v18  ;;  %1238 = vmatprep.mubr.msk.bf16.mxu1 %vm247_vm1, %v1275_v19 }
  0x26   :  { %1207 = vmatmul.mubr.msk.bf16.gmra.mrb[16].mxu0 %vm247_vm1, %v1276_v20  ;;  %1239 = vmatmul.mubr.msk.bf16.gmra.mrb[16].mxu1 %vm247_vm1, %v1277_v21 }
  0x27   :  { %1210 = vmatprep.mubr.msk.bf16.mxu0 %vm247_vm1, %v1278_v22  ;;  %1242 = vmatprep.mubr.msk.bf16.mxu1 %vm247_vm1, %v1279_v23 }
  0x2e   :  { %1211 = vmatmul.mubr.msk.bf16.gmra.mrb[20].mxu0 %vm247_vm1, %v1280_v24  ;;  %1243 = vmatmul.mubr.msk.bf16.gmra.mrb[20].mxu1 %vm247_vm1, %v1281_v25 }
  0x2f   :  { %1214 = vmatprep.mubr.msk.bf16.mxu0 %vm247_vm1, %v1282_v26  ;;  %1246 = vmatprep.mubr.msk.bf16.mxu1 %vm247_vm1, %v1283_v27 }
  0x36   :  { %1215 = vmatmul.mubr.msk.bf16.gmra.mrb[24].mxu0 %vm247_vm1, %v1284_v28  ;;  %1247 = vmatmul.mubr.msk.bf16.gmra.mrb[24].mxu1 %vm247_vm1, %v1285_v29 }
  0x37   :  { %1218 = vmatprep.mubr.msk.bf16.mxu0 %vm247_vm1, %v1286_v30  ;;  %1250 = vmatprep.mubr.msk.bf16.mxu1 %vm247_vm1, %v1287_v31 }
  0x3e   :  { %1219 = vmatmul.mubr.msk.bf16.gmra.mrb[28].mxu0 %vm247_vm1, %v1288_v32  ;;  %1251 = vmatmul.mubr.msk.bf16.gmra.mrb[28].mxu1 %vm247_vm1, %v1289_v33 }
  0xd9   :  { %v1192_v35 = vpop.f32.mrb[0].mxu0  ;;  %v1224_v37 = vpop.f32.mrb[0].mxu1 }
  0xda   :  { %v391_v36 = vadd.f32 %v1192_v35, %v1444_v34  ;;  %v382_v38 = vpop.f32.mrb[1].mxu0  ;;  %v519_v39 = vadd.f32 %v1224_v37, %v1444_v34  ;;  %v510_v41 = vpop.f32.mrb[1].mxu1 }
  0xdb   :  { %v383_v40 = vadd.f32 %v1444_v34, %v382_v38  ;;  %v1193_v42 = vpop.f32.mrb[2].mxu0  ;;  %v511_v44 = vadd.f32 %v1444_v34, %v510_v41  ;;  %v1225_v46 = vpop.f32.mrb[2].mxu1 }
  0xdc   :  { %v1093_v43 = vpack.c.bf16 %v391_v36, %v391_v36  ;;  %v394_v45 = vadd.f32 %v1193_v42, %v1444_v34  ;;  %v385_v47 = vpop.f32.mrb[3].mxu0  ;;  %v1125_v48 = vpack.c.bf16 %v519_v39, %v519_v39  ;;  %v522_v50 = vadd.f32 %v1225_v46, %v1444_v34  ;;  %v513_v52 = vpop.f32.mrb[3].mxu1 }
  0xdd   :  { %v1091_v49 = vpack.c.bf16 %v383_v40, %v383_v40  ;;  %v386_v51 = vadd.f32 %v1444_v34, %v385_v47  ;;  %v1123_v53 = vpack.c.bf16 %v511_v44, %v511_v44  ;;  %v514_v55 = vadd.f32 %v1444_v34, %v513_v52 }
  0xde   :  { %896 = vst.msk [vmem:[%s1769_s3 + $0x8] sm:$0xf] %vm893_vm2, %v1093_v43  ;;  %v1094_v54 = vpack.c.bf16 %v394_v45, %v394_v45  ;;  %928 = vst.msk [vmem:[%s1769_s3 + $0x88] sm:$0xf] %vm893_vm2, %v1125_v48  ;;  %v1126_v56 = vpack.c.bf16 %v522_v50, %v522_v50 }
  0xdf   :  { %894 = vst.msk [vmem:[%s1769_s3] sm:$0xf] %vm893_vm2, %v1091_v49  ;;  %v1092_v57 = vpack.c.bf16 %v386_v51, %v386_v51  ;;  %926 = vst.msk [vmem:[%s1769_s3 + $0x80] sm:$0xf] %vm893_vm2, %v1123_v53  ;;  %v1124_v58 = vpack.c.bf16 %v514_v55, %v514_v55 }
  0xe0   :  { %897 = vst.msk [vmem:[%s1769_s3 + $0xc] sm:$0xf] %vm893_vm2, %v1094_v54  ;;  %929 = vst.msk [vmem:[%s1769_s3 + $0x8c] sm:$0xf] %vm893_vm2, %v1126_v56 }
  0xe1   :  { %895 = vst.msk [vmem:[%s1769_s3 + $0x4] sm:$0xf] %vm893_vm2, %v1092_v57  ;;  %v1196_v59 = vpop.f32.mrb[4].mxu0  ;;  %927 = vst.msk [vmem:[%s1769_s3 + $0x84] sm:$0xf] %vm893_vm2, %v1124_v58  ;;  %v1228_v61 = vpop.f32.mrb[4].mxu1 }
  0xe2   :  { %v407_v60 = vadd.f32 %v1196_v59, %v1444_v34  ;;  %v398_v62 = vpop.f32.mrb[5].mxu0  ;;  %v535_v63 = vadd.f32 %v1228_v61, %v1444_v34  ;;  %v526_v1 = vpop.f32.mrb[5].mxu1 }
  0xe3   :  { %v399_v0 = vadd.f32 %v1444_v34, %v398_v62  ;;  %v1197_v2 = vpop.f32.mrb[6].mxu0  ;;  %v527_v4 = vadd.f32 %v1444_v34, %v526_v1  ;;  %v1229_v6 = vpop.f32.mrb[6].mxu1 }
  0xe4   :  { %v1097_v3 = vpack.c.bf16 %v407_v60, %v407_v60  ;;  %v410_v5 = vadd.f32 %v1197_v2, %v1444_v34  ;;  %v401_v7 = vpop.f32.mrb[7].mxu0  ;;  %v1129_v8 = vpack.c.bf16 %v535_v63, %v535_v63  ;;  %v538_v10 = vadd.f32 %v1229_v6, %v1444_v34  ;;  %v529_v12 = vpop.f32.mrb[7].mxu1 }
  0xe5   :  { %v1095_v9 = vpack.c.bf16 %v399_v0, %v399_v0  ;;  %v402_v11 = vadd.f32 %v1444_v34, %v401_v7  ;;  %v1127_v13 = vpack.c.bf16 %v527_v4, %v527_v4  ;;  %v530_v15 = vadd.f32 %v1444_v34, %v529_v12 }
  0xe6   :  { %900 = vst.msk [vmem:[%s1769_s3 + $0x18] sm:$0xf] %vm893_vm2, %v1097_v3  ;;  %v1098_v14 = vpack.c.bf16 %v410_v5, %v410_v5  ;;  %932 = vst.msk [vmem:[%s1769_s3 + $0x98] sm:$0xf] %vm893_vm2, %v1129_v8  ;;  %v1130_v16 = vpack.c.bf16 %v538_v10, %v538_v10 }
  0xe7   :  { %898 = vst.msk [vmem:[%s1769_s3 + $0x10] sm:$0xf] %vm893_vm2, %v1095_v9  ;;  %v1096_v17 = vpack.c.bf16 %v402_v11, %v402_v11  ;;  %930 = vst.msk [vmem:[%s1769_s3 + $0x90] sm:$0xf] %vm893_vm2, %v1127_v13  ;;  %v1128_v18 = vpack.c.bf16 %v530_v15, %v530_v15 }
  0xe8   :  { %901 = vst.msk [vmem:[%s1769_s3 + $0x1c] sm:$0xf] %vm893_vm2, %v1098_v14  ;;  %933 = vst.msk [vmem:[%s1769_s3 + $0x9c] sm:$0xf] %vm893_vm2, %v1130_v16 }
  0xe9   :  { %899 = vst.msk [vmem:[%s1769_s3 + $0x14] sm:$0xf] %vm893_vm2, %v1096_v17  ;;  %v1200_v19 = vpop.f32.mrb[8].mxu0  ;;  %931 = vst.msk [vmem:[%s1769_s3 + $0x94] sm:$0xf] %vm893_vm2, %v1128_v18  ;;  %v1232_v21 = vpop.f32.mrb[8].mxu1 }
  0xea   :  { %v423_v20 = vadd.f32 %v1200_v19, %v1444_v34  ;;  %v414_v22 = vpop.f32.mrb[9].mxu0  ;;  %v551_v23 = vadd.f32 %v1232_v21, %v1444_v34  ;;  %v542_v25 = vpop.f32.mrb[9].mxu1 }
  0xeb   :  { %v415_v24 = vadd.f32 %v1444_v34, %v414_v22  ;;  %v1201_v26 = vpop.f32.mrb[10].mxu0  ;;  %v543_v28 = vadd.f32 %v1444_v34, %v542_v25  ;;  %v1233_v30 = vpop.f32.mrb[10].mxu1 }
  0xec   :  { %v1101_v27 = vpack.c.bf16 %v423_v20, %v423_v20  ;;  %v426_v29 = vadd.f32 %v1201_v26, %v1444_v34  ;;  %v417_v31 = vpop.f32.mrb[11].mxu0  ;;  %v1133_v32 = vpack.c.bf16 %v551_v23, %v551_v23  ;;  %v554_v35 = vadd.f32 %v1233_v30, %v1444_v34  ;;  %v545_v37 = vpop.f32.mrb[11].mxu1 }
  0xed   :  { %v1099_v33 = vpack.c.bf16 %v415_v24, %v415_v24  ;;  %v418_v36 = vadd.f32 %v1444_v34, %v417_v31  ;;  %v1131_v38 = vpack.c.bf16 %v543_v28, %v543_v28  ;;  %v546_v40 = vadd.f32 %v1444_v34, %v545_v37 }
  0xee   :  { %904 = vst.msk [vmem:[%s1769_s3 + $0x28] sm:$0xf] %vm893_vm2, %v1101_v27  ;;  %v1102_v39 = vpack.c.bf16 %v426_v29, %v426_v29  ;;  %936 = vst.msk [vmem:[%s1769_s3 + $0xa8] sm:$0xf] %vm893_vm2, %v1133_v32  ;;  %v1134_v41 = vpack.c.bf16 %v554_v35, %v554_v35 }
  0xef   :  { %902 = vst.msk [vmem:[%s1769_s3 + $0x20] sm:$0xf] %vm893_vm2, %v1099_v33  ;;  %v1100_v42 = vpack.c.bf16 %v418_v36, %v418_v36  ;;  %934 = vst.msk [vmem:[%s1769_s3 + $0xa0] sm:$0xf] %vm893_vm2, %v1131_v38  ;;  %v1132_v43 = vpack.c.bf16 %v546_v40, %v546_v40 }
  0xf0   :  { %905 = vst.msk [vmem:[%s1769_s3 + $0x2c] sm:$0xf] %vm893_vm2, %v1102_v39  ;;  %937 = vst.msk [vmem:[%s1769_s3 + $0xac] sm:$0xf] %vm893_vm2, %v1134_v41 }
  0xf1   :  { %903 = vst.msk [vmem:[%s1769_s3 + $0x24] sm:$0xf] %vm893_vm2, %v1100_v42  ;;  %v1204_v44 = vpop.f32.mrb[12].mxu0  ;;  %935 = vst.msk [vmem:[%s1769_s3 + $0xa4] sm:$0xf] %vm893_vm2, %v1132_v43  ;;  %v1236_v46 = vpop.f32.mrb[12].mxu1 }
  0xf2   :  { %v439_v45 = vadd.f32 %v1204_v44, %v1444_v34  ;;  %v430_v47 = vpop.f32.mrb[13].mxu0  ;;  %v567_v48 = vadd.f32 %v1236_v46, %v1444_v34  ;;  %v558_v50 = vpop.f32.mrb[13].mxu1 }
  0xf3   :  { %v431_v49 = vadd.f32 %v1444_v34, %v430_v47  ;;  %v1205_v51 = vpop.f32.mrb[14].mxu0  ;;  %v559_v53 = vadd.f32 %v1444_v34, %v558_v50  ;;  %v1237_v55 = vpop.f32.mrb[14].mxu1 }
  0xf4   :  { %v1105_v52 = vpack.c.bf16 %v439_v45, %v439_v45  ;;  %v442_v54 = vadd.f32 %v1205_v51, %v1444_v34  ;;  %v433_v56 = vpop.f32.mrb[15].mxu0  ;;  %v1137_v57 = vpack.c.bf16 %v567_v48, %v567_v48  ;;  %v570_v59 = vadd.f32 %v1237_v55, %v1444_v34  ;;  %v561_v61 = vpop.f32.mrb[15].mxu1 }
  0xf5   :  { %v1103_v58 = vpack.c.bf16 %v431_v49, %v431_v49  ;;  %v434_v60 = vadd.f32 %v1444_v34, %v433_v56  ;;  %v1135_v62 = vpack.c.bf16 %v559_v53, %v559_v53  ;;  %v562_v0 = vadd.f32 %v1444_v34, %v561_v61 }
  0xf6   :  { %908 = vst.msk [vmem:[%s1769_s3 + $0x38] sm:$0xf] %vm893_vm2, %v1105_v52  ;;  %v1106_v63 = vpack.c.bf16 %v442_v54, %v442_v54  ;;  %940 = vst.msk [vmem:[%s1769_s3 + $0xb8] sm:$0xf] %vm893_vm2, %v1137_v57  ;;  %v1138_v1 = vpack.c.bf16 %v570_v59, %v570_v59 }
  0xf7   :  { %906 = vst.msk [vmem:[%s1769_s3 + $0x30] sm:$0xf] %vm893_vm2, %v1103_v58  ;;  %v1104_v2 = vpack.c.bf16 %v434_v60, %v434_v60  ;;  %938 = vst.msk [vmem:[%s1769_s3 + $0xb0] sm:$0xf] %vm893_vm2, %v1135_v62  ;;  %v1136_v3 = vpack.c.bf16 %v562_v0, %v562_v0 }
  0xf8   :  { %909 = vst.msk [vmem:[%s1769_s3 + $0x3c] sm:$0xf] %vm893_vm2, %v1106_v63  ;;  %941 = vst.msk [vmem:[%s1769_s3 + $0xbc] sm:$0xf] %vm893_vm2, %v1138_v1 }
  0xf9   :  { %907 = vst.msk [vmem:[%s1769_s3 + $0x34] sm:$0xf] %vm893_vm2, %v1104_v2  ;;  %v1208_v4 = vpop.f32.mrb[16].mxu0  ;;  %939 = vst.msk [vmem:[%s1769_s3 + $0xb4] sm:$0xf] %vm893_vm2, %v1136_v3  ;;  %v1240_v6 = vpop.f32.mrb[16].mxu1 }
  0xfa   :  { %v455_v5 = vadd.f32 %v1208_v4, %v1444_v34  ;;  %v446_v7 = vpop.f32.mrb[17].mxu0  ;;  %v583_v8 = vadd.f32 %v1240_v6, %v1444_v34  ;;  %v574_v10 = vpop.f32.mrb[17].mxu1 }
  0xfb   :  { %v447_v9 = vadd.f32 %v1444_v34, %v446_v7  ;;  %v1209_v11 = vpop.f32.mrb[18].mxu0  ;;  %v575_v13 = vadd.f32 %v1444_v34, %v574_v10  ;;  %v1241_v15 = vpop.f32.mrb[18].mxu1 }
  0xfc   :  { %v1109_v12 = vpack.c.bf16 %v455_v5, %v455_v5  ;;  %v458_v14 = vadd.f32 %v1209_v11, %v1444_v34  ;;  %v449_v16 = vpop.f32.mrb[19].mxu0  ;;  %v1141_v17 = vpack.c.bf16 %v583_v8, %v583_v8  ;;  %v586_v19 = vadd.f32 %v1241_v15, %v1444_v34  ;;  %v577_v21 = vpop.f32.mrb[19].mxu1 }
  0xfd   :  { %v1107_v18 = vpack.c.bf16 %v447_v9, %v447_v9  ;;  %v450_v20 = vadd.f32 %v1444_v34, %v449_v16  ;;  %v1139_v22 = vpack.c.bf16 %v575_v13, %v575_v13  ;;  %v578_v24 = vadd.f32 %v1444_v34, %v577_v21 }
  0xfe   :  { %912 = vst.msk [vmem:[%s1769_s3 + $0x48] sm:$0xf] %vm893_vm2, %v1109_v12  ;;  %v1110_v23 = vpack.c.bf16 %v458_v14, %v458_v14  ;;  %944 = vst.msk [vmem:[%s1769_s3 + $0xc8] sm:$0xf] %vm893_vm2, %v1141_v17  ;;  %v1142_v25 = vpack.c.bf16 %v586_v19, %v586_v19 }
  0xff   :  { %910 = vst.msk [vmem:[%s1769_s3 + $0x40] sm:$0xf] %vm893_vm2, %v1107_v18  ;;  %v1108_v26 = vpack.c.bf16 %v450_v20, %v450_v20  ;;  %942 = vst.msk [vmem:[%s1769_s3 + $0xc0] sm:$0xf] %vm893_vm2, %v1139_v22  ;;  %v1140_v27 = vpack.c.bf16 %v578_v24, %v578_v24 }
 0x100   :  { %913 = vst.msk [vmem:[%s1769_s3 + $0x4c] sm:$0xf] %vm893_vm2, %v1110_v23  ;;  %945 = vst.msk [vmem:[%s1769_s3 + $0xcc] sm:$0xf] %vm893_vm2, %v1142_v25 }
 0x101   :  { %911 = vst.msk [vmem:[%s1769_s3 + $0x44] sm:$0xf] %vm893_vm2, %v1108_v26  ;;  %v1212_v28 = vpop.f32.mrb[20].mxu0  ;;  %943 = vst.msk [vmem:[%s1769_s3 + $0xc4] sm:$0xf] %vm893_vm2, %v1140_v27  ;;  %v1244_v30 = vpop.f32.mrb[20].mxu1 }
 0x102   :  { %v471_v29 = vadd.f32 %v1212_v28, %v1444_v34  ;;  %v462_v31 = vpop.f32.mrb[21].mxu0  ;;  %v599_v32 = vadd.f32 %v1244_v30, %v1444_v34  ;;  %v590_v35 = vpop.f32.mrb[21].mxu1 }
 0x103   :  { %v463_v33 = vadd.f32 %v1444_v34, %v462_v31  ;;  %v1213_v36 = vpop.f32.mrb[22].mxu0  ;;  %v591_v38 = vadd.f32 %v1444_v34, %v590_v35  ;;  %v1245_v40 = vpop.f32.mrb[22].mxu1 }
 0x104   :  { %v1113_v37 = vpack.c.bf16 %v471_v29, %v471_v29  ;;  %v474_v39 = vadd.f32 %v1213_v36, %v1444_v34  ;;  %v465_v41 = vpop.f32.mrb[23].mxu0  ;;  %v1145_v42 = vpack.c.bf16 %v599_v32, %v599_v32  ;;  %v602_v44 = vadd.f32 %v1245_v40, %v1444_v34  ;;  %v593_v46 = vpop.f32.mrb[23].mxu1 }
 0x105   :  { %v1111_v43 = vpack.c.bf16 %v463_v33, %v463_v33  ;;  %v466_v45 = vadd.f32 %v1444_v34, %v465_v41  ;;  %v1143_v47 = vpack.c.bf16 %v591_v38, %v591_v38  ;;  %v594_v49 = vadd.f32 %v1444_v34, %v593_v46 }
 0x106   :  { %916 = vst.msk [vmem:[%s1769_s3 + $0x58] sm:$0xf] %vm893_vm2, %v1113_v37  ;;  %v1114_v48 = vpack.c.bf16 %v474_v39, %v474_v39  ;;  %948 = vst.msk [vmem:[%s1769_s3 + $0xd8] sm:$0xf] %vm893_vm2, %v1145_v42  ;;  %v1146_v50 = vpack.c.bf16 %v602_v44, %v602_v44 }
 0x107   :  { %914 = vst.msk [vmem:[%s1769_s3 + $0x50] sm:$0xf] %vm893_vm2, %v1111_v43  ;;  %v1112_v51 = vpack.c.bf16 %v466_v45, %v466_v45  ;;  %946 = vst.msk [vmem:[%s1769_s3 + $0xd0] sm:$0xf] %vm893_vm2, %v1143_v47  ;;  %v1144_v52 = vpack.c.bf16 %v594_v49, %v594_v49 }
 0x108   :  { %917 = vst.msk [vmem:[%s1769_s3 + $0x5c] sm:$0xf] %vm893_vm2, %v1114_v48  ;;  %949 = vst.msk [vmem:[%s1769_s3 + $0xdc] sm:$0xf] %vm893_vm2, %v1146_v50 }
 0x109   :  { %915 = vst.msk [vmem:[%s1769_s3 + $0x54] sm:$0xf] %vm893_vm2, %v1112_v51  ;;  %v1216_v53 = vpop.f32.mrb[24].mxu0  ;;  %947 = vst.msk [vmem:[%s1769_s3 + $0xd4] sm:$0xf] %vm893_vm2, %v1144_v52  ;;  %v1248_v55 = vpop.f32.mrb[24].mxu1 }
 0x10a   :  { %v487_v54 = vadd.f32 %v1216_v53, %v1444_v34  ;;  %v478_v56 = vpop.f32.mrb[25].mxu0  ;;  %v615_v57 = vadd.f32 %v1248_v55, %v1444_v34  ;;  %v606_v59 = vpop.f32.mrb[25].mxu1 }
 0x10b   :  { %v479_v58 = vadd.f32 %v1444_v34, %v478_v56  ;;  %v1217_v60 = vpop.f32.mrb[26].mxu0  ;;  %v607_v62 = vadd.f32 %v1444_v34, %v606_v59  ;;  %v1249_v0 = vpop.f32.mrb[26].mxu1 }
 0x10c   :  { %v1117_v61 = vpack.c.bf16 %v487_v54, %v487_v54  ;;  %v490_v63 = vadd.f32 %v1217_v60, %v1444_v34  ;;  %v481_v1 = vpop.f32.mrb[27].mxu0  ;;  %v1149_v2 = vpack.c.bf16 %v615_v57, %v615_v57  ;;  %v618_v4 = vadd.f32 %v1249_v0, %v1444_v34  ;;  %v609_v6 = vpop.f32.mrb[27].mxu1 }
 0x10d   :  { %v1115_v3 = vpack.c.bf16 %v479_v58, %v479_v58  ;;  %v482_v5 = vadd.f32 %v1444_v34, %v481_v1  ;;  %v1147_v7 = vpack.c.bf16 %v607_v62, %v607_v62  ;;  %v610_v9 = vadd.f32 %v1444_v34, %v609_v6 }
 0x10e   :  { %920 = vst.msk [vmem:[%s1769_s3 + $0x68] sm:$0xf] %vm893_vm2, %v1117_v61  ;;  %v1118_v8 = vpack.c.bf16 %v490_v63, %v490_v63  ;;  %952 = vst.msk [vmem:[%s1769_s3 + $0xe8] sm:$0xf] %vm893_vm2, %v1149_v2  ;;  %v1150_v10 = vpack.c.bf16 %v618_v4, %v618_v4 }
 0x10f   :  { %918 = vst.msk [vmem:[%s1769_s3 + $0x60] sm:$0xf] %vm893_vm2, %v1115_v3  ;;  %v1116_v11 = vpack.c.bf16 %v482_v5, %v482_v5  ;;  %950 = vst.msk [vmem:[%s1769_s3 + $0xe0] sm:$0xf] %vm893_vm2, %v1147_v7  ;;  %v1148_v12 = vpack.c.bf16 %v610_v9, %v610_v9 }
 0x110   :  { %921 = vst.msk [vmem:[%s1769_s3 + $0x6c] sm:$0xf] %vm893_vm2, %v1118_v8  ;;  %953 = vst.msk [vmem:[%s1769_s3 + $0xec] sm:$0xf] %vm893_vm2, %v1150_v10 }
 0x111   :  { %919 = vst.msk [vmem:[%s1769_s3 + $0x64] sm:$0xf] %vm893_vm2, %v1116_v11  ;;  %v1220_v13 = vpop.f32.mrb[28].mxu0  ;;  %951 = vst.msk [vmem:[%s1769_s3 + $0xe4] sm:$0xf] %vm893_vm2, %v1148_v12  ;;  %v1252_v15 = vpop.f32.mrb[28].mxu1 }
 0x112   :  { %v503_v14 = vadd.f32 %v1220_v13, %v1444_v34  ;;  %v494_v16 = vpop.f32.mrb[29].mxu0  ;;  %v631_v17 = vadd.f32 %v1252_v15, %v1444_v34  ;;  %v622_v19 = vpop.f32.mrb[29].mxu1 }
 0x113   :  { %v495_v18 = vadd.f32 %v1444_v34, %v494_v16  ;;  %v1221_v20 = vpop.f32.mrb[30].mxu0  ;;  %v623_v22 = vadd.f32 %v1444_v34, %v622_v19  ;;  %v1253_v24 = vpop.f32.mrb[30].mxu1 }
 0x114   :  { %v1121_v21 = vpack.c.bf16 %v503_v14, %v503_v14  ;;  %v506_v23 = vadd.f32 %v1221_v20, %v1444_v34  ;;  %v497_v25 = vpop.f32.mrb[31].mxu0  ;;  %v1153_v26 = vpack.c.bf16 %v631_v17, %v631_v17  ;;  %v634_v28 = vadd.f32 %v1253_v24, %v1444_v34  ;;  %v625_v30 = vpop.f32.mrb[31].mxu1 }
 0x115   :  { %v1119_v27 = vpack.c.bf16 %v495_v18, %v495_v18  ;;  %v498_v29 = vadd.f32 %v1444_v34, %v497_v25  ;;  %v1151_v31 = vpack.c.bf16 %v623_v22, %v623_v22  ;;  %v626_v33 = vadd.f32 %v1444_v34, %v625_v30 }
 0x116   :  { %924 = vst.msk [vmem:[%s1769_s3 + $0x78] sm:$0xf] %vm893_vm2, %v1121_v21  ;;  %v1122_v32 = vpack.c.bf16 %v506_v23, %v506_v23  ;;  %956 = vst.msk [vmem:[%s1769_s3 + $0xf8] sm:$0xf] %vm893_vm2, %v1153_v26  ;;  %v1154_v35 = vpack.c.bf16 %v634_v28, %v634_v28 }
 0x117   :  { %922 = vst.msk [vmem:[%s1769_s3 + $0x70] sm:$0xf] %vm893_vm2, %v1119_v27  ;;  %v1120_v36 = vpack.c.bf16 %v498_v29, %v498_v29  ;;  %954 = vst.msk [vmem:[%s1769_s3 + $0xf0] sm:$0xf] %vm893_vm2, %v1151_v31  ;;  %v1152_v34 = vpack.c.bf16 %v626_v33, %v626_v33 }
 0x118   :  { %925 = vst.msk [vmem:[%s1769_s3 + $0x7c] sm:$0xf] %vm893_vm2, %v1122_v32  ;;  %957 = vst.msk [vmem:[%s1769_s3 + $0xfc] sm:$0xf] %vm893_vm2, %v1154_v35 }
 0x119   :  { %923 = vst.msk [vmem:[%s1769_s3 + $0x74] sm:$0xf] %vm893_vm2, %v1120_v36  ;;  %955 = vst.msk [vmem:[%s1769_s3 + $0xf4] sm:$0xf] %vm893_vm2, %v1152_v34 }

</bundles_post_ra>
